<compile_context>
chip_gen: v5e
topology: v5e:2x2
jax: 0.10.0
libtpu: 0.0.40
codegen_flags: <defaults>
</compile_context>

<pallas_src>
import jax
import jax.numpy as jnp
from jax.experimental import pallas as pl
from jax.experimental.pallas import tpu as pltpu


def _linear_kernel(x_ref, w_ref, b_ref, o_ref):
    # VPU elementwise multiply + XLU lane reduction; f32 accumulate.
    x = x_ref[...].astype(jnp.float32)            # (TILE_B, F)
    w = w_ref[...].astype(jnp.float32)            # (1, F) -> broadcast over rows
    acc = jnp.sum(x * w, axis=-1, keepdims=True)  # (TILE_B, 1)
    o_ref[...] = (acc + b_ref[...]).astype(o_ref.dtype)


def logistic_regression_forward(x, weight, bias, *, tile_b=None):
    """Forward of nn.Linear(F, 1): logits = x @ weight.T + bias.

    x: (B, F); weight: (1, F) (PyTorch layout, used as-is — no transpose needed
    since the kernel does a broadcast-multiply + lane reduction); bias: (1,).
    Returns (B, 1) logits.
    """
    B, F = x.shape
    out_dtype = x.dtype

    # --- Pick a batch tile so 2x (double-buffered) x tiles fit every generation.
    # Budget ~12 MiB per x buffer -> ~24 MiB double-buffered, well under the
    # 48 MiB scoped limit requested below (and under v7x's 64 MiB physical VMEM).
    if tile_b is None:
        per_buf_bytes = 12 * 1024 * 1024
        tb = per_buf_bytes // max(1, F * x.dtype.itemsize)
        tile_b = max(8, min(1024, (tb // 8) * 8))
    # Never use a tile bigger than the (sublane-rounded) batch itself; keep the
    # tile a multiple of 8 so the (8, 128) sublane constraint is satisfied.
    tile_b = max(8, (tile_b // 8) * 8)
    tile_b = min(tile_b, max(8, ((B + 7) // 8) * 8))

    # Tail correctness: pad batch so the last grid step is a full tile.
    num_tiles = pl.cdiv(B, tile_b)
    b_pad = num_tiles * tile_b
    if b_pad != B:
        x = jnp.pad(x, ((0, b_pad - B), (0, 0)))

    b2d = bias.reshape(1, 1).astype(jnp.float32)

    cost = pl.CostEstimate(
        flops=2 * B * F,
        transcendentals=0,
        bytes_accessed=B * F * x.dtype.itemsize + F * 4 + B * x.dtype.itemsize,
    )

    out = pl.pallas_call(
        _linear_kernel,
        out_shape=jax.ShapeDtypeStruct((b_pad, 1), out_dtype),
        grid_spec=pltpu.PrefetchScalarGridSpec(
            num_scalar_prefetch=0,
            grid=(num_tiles,),
            in_specs=[
                # x: one batch tile per grid step -> pipelined prefetch.
                pl.BlockSpec((tile_b, F), lambda i: (i, 0)),
                # weight / bias: constant index_map -> stay resident in VMEM.
                pl.BlockSpec((1, F), lambda i: (0, 0)),
                pl.BlockSpec((1, 1), lambda i: (0, 0)),
            ],
            out_specs=pl.BlockSpec((tile_b, 1), lambda i: (i, 0)),
        ),
        compiler_params=pltpu.CompilerParams(
            # Independent batch tiles: shard across v7x's two TensorCores.
            dimension_semantics=("parallel",),
            # Above the 16/32 MiB scoped defaults (v5e/v6e), below v7x's 64 MiB.
            vmem_limit_bytes=48 * 1024 * 1024,
        ),
        cost_estimate=cost,
    )(x, weight, b2d)

    return out[:B] if b_pad != B else out


if __name__ == "__main__":
    key = jax.random.PRNGKey(0)
    k_x, k_w, k_b = jax.random.split(key, 3)

    batch = 8
    n_input_features = 32

    # Deterministic parameter init mimicking nn.Linear: U(-1/sqrt(F), 1/sqrt(F))
    bound = 1.0 / jnp.sqrt(jnp.float32(n_input_features))
    weight = jax.random.uniform(k_w, (1, n_input_features), jnp.float32, -bound, bound)
    bias = jax.random.uniform(k_b, (1,), jnp.float32, -bound, bound)

    x = jax.random.normal(k_x, (batch, n_input_features), jnp.float32)

    logits = logistic_regression_forward(x, weight, bias)
    logits = jax.block_until_ready(logits)

    ref = x @ weight.T + bias
    assert logits.shape == (batch, 1)
    assert jnp.allclose(logits, ref, atol=1e-5, rtol=1e-5)

    # Exercise the batch-tiling + tail-padding path (B not a multiple of tile_b).
    k_x2 = jax.random.fold_in(k_x, 1)
    x2 = jax.random.normal(k_x2, (20, n_input_features), jnp.float32)
    logits2 = jax.block_until_ready(
        logistic_regression_forward(x2, weight, bias, tile_b=8)
    )
    ref2 = x2 @ weight.T + bias
    assert logits2.shape == (20, 1)
    assert jnp.allclose(logits2, ref2, atol=1e-5, rtol=1e-5)

    print("KERNEL_OK")
</pallas_src>

<mosaic_0001>
module attributes {stable_mosaic.version = 11 : i64} {
  func.func @_linear_kernel(%arg0: i32, %arg1: memref<8x32xf32, #tpu.memory_space<vmem>>, %arg2: memref<1x32xf32, #tpu.memory_space<vmem>>, %arg3: memref<1x1xf32, #tpu.memory_space<vmem>>, %arg4: memref<8x1xf32, #tpu.memory_space<vmem>>) attributes {dimension_semantics = [#tpu.dimension_semantics<parallel>], iteration_bounds = array<i64: 1>, scalar_prefetch = 0 : i64, scratch_operands = 0 : i64, tpu.core_type = #tpu.core_type<tc>, window_params = [{transform_indices = @transform_0, window_bounds = array<i64: 8, 32>}, {pipeline_mode = #tpu.pipeline_mode<synchronous>, transform_indices = @transform_1, window_bounds = array<i64: 1, 32>}, {pipeline_mode = #tpu.pipeline_mode<synchronous>, transform_indices = @transform_2, window_bounds = array<i64: 1, 1>}, {transform_indices = @transform_3, window_bounds = array<i64: 8, 1>}]} {
    %c0 = arith.constant 0 : index
    %c0_0 = arith.constant 0 : index
    %0 = vector.load %arg1[%c0, %c0_0] : memref<8x32xf32, #tpu.memory_space<vmem>>, vector<8x32xf32>
    %c0_1 = arith.constant 0 : index
    %c0_2 = arith.constant 0 : index
    %1 = vector.load %arg2[%c0_1, %c0_2] : memref<1x32xf32, #tpu.memory_space<vmem>>, vector<1x32xf32>
    %2 = vector.broadcast %1 : vector<1x32xf32> to vector<8x32xf32>
    %3 = arith.mulf %0, %2 : vector<8x32xf32>
    %cst = arith.constant dense<0.000000e+00> : vector<8xf32>
    %4 = vector.multi_reduction <add>, %3, %cst [1] : vector<8x32xf32> to vector<8xf32>
    %5 = vector.shape_cast %4 : vector<8xf32> to vector<8x1xf32>
    %c0_3 = arith.constant 0 : index
    %c0_4 = arith.constant 0 : index
    %6 = vector.load %arg3[%c0_3, %c0_4] : memref<1x1xf32, #tpu.memory_space<vmem>>, vector<1x1xf32>
    %7 = vector.broadcast %6 : vector<1x1xf32> to vector<8x1xf32>
    %8 = arith.addf %5, %7 : vector<8x1xf32>
    %c0_5 = arith.constant 0 : index
    %c0_6 = arith.constant 0 : index
    %9 = vector.load %arg4[%c0_5, %c0_6] : memref<8x1xf32, #tpu.memory_space<vmem>>, vector<8x1xf32>
    tpu.vector_store %arg4[%c0_5, %c0_6], %8 {strides = array<i32>} : memref<8x1xf32, #tpu.memory_space<vmem>>, vector<8x1xf32>,
    return
  }
  func.func @transform_0(%arg0: i32) -> (i32, i32) {
    %c0_i32 = arith.constant 0 : i32
    %c0_i32_0 = arith.constant 0 : i32
    return %arg0, %c0_i32 : i32, i32
  }
  func.func @transform_1(%arg0: i32) -> (i32, i32) {
    %c0_i32 = arith.constant 0 : i32
    %c0_i32_0 = arith.constant 0 : i32
    %c0_i32_1 = arith.constant 0 : i32
    return %c0_i32, %c0_i32_0 : i32, i32
  }
  func.func @transform_2(%arg0: i32) -> (i32, i32) {
    %c0_i32 = arith.constant 0 : i32
    %c0_i32_0 = arith.constant 0 : i32
    %c0_i32_1 = arith.constant 0 : i32
    return %c0_i32, %c0_i32_0 : i32, i32
  }
  func.func @transform_3(%arg0: i32) -> (i32, i32) {
    %c0_i32 = arith.constant 0 : i32
    %c0_i32_0 = arith.constant 0 : i32
    return %arg0, %c0_i32 : i32, i32
  }
}

</mosaic_0001>

<bundles_post_ra>
// kernel: tpu_custom_call.1
= control target key start
LH: loop header
LB: loop body
LE: loop exit
PB: predicated region body
PF: predicated region fallthrough
CT: control target
= control target key end

     0   :  { %s114_s0 = inlined_call_operand.hbm [shape: f32[8,32], index: 0, kind: input, shape index: {}]   ;;  %s115_s1 = inlined_call_operand.vmem [shape: f32[1,32], index: 1, kind: input, shape index: {}]   ;;  %s116_s2 = inlined_call_operand.<no memory space> [shape: f32[1,1], index: 2, kind: input, shape index: {}]   ;;  %s117_s3 = inlined_call_operand.vmem [shape: f32[8,1], index: 3, kind: output, shape index: {}]  }
   0x1   :  { %v8_v0 = vstv %s116_s2 }
   0x2   :  { %9 = vst [vmem:[#allocation2] sm:$0x1] %v8_v0 }
   0x3   :  { %10 = vsyncpa [#allocation4], 0  ;;  %s16_s16 = sshll.u32 %s114_s0, 4  ;;  %s81_s17 = smov [#allocation3]   ;;  %s17_s16 = int_to_ptr.hbm [resolvable:$true] %s16_s16 }
   0x4   :  { %s18_s18 = sshll.u32 %s81_s17, 4  ;;  %s19_s18 = int_to_ptr.vmem [resolvable:$true] %s18_s18 }
   0x5   :  { %21 = dma.hbm_to_vmem [thread:$0]  %s17_s16, 128, %s19_s18, [#allocation4]  }
   0x6   :  { %79 = dma.done.wait [#allocation4], 128  }
   0x7   :  { %80 = vsyncadd [#allocation4], 4294967168  ;;  %v30_v1 = vld [vmem:[#allocation3] sm:$0xff]  ;;  %v53_v2 = vld [vmem:[%s115_s1] ss:$0 sm:$0xff]  ;;  %vm36_vm0 = vcmask 261120  }
   0x8   :  { %v35_v3 = vmul.f32 %v53_v2, %v30_v1  ;;  %vm45_vm1 = vcmask 7168  }
   0x9   :  { %v54_v5 = vld [vmem:[#allocation2] ss:$0 sm:$0xff] }
   0xa   :  { %v37_v4 = vsel %vm36_vm0, %v35_v3, 0.0 }
   0xb   :  { %38 = vadd.xlane.f32.xlu0 %v37_v4 }
  0x7e   :  { %v39_v6 = vpop.xlane.xlu0 %38 }
  0x7f   :  { %v44_v7 = vadd.f32 %v54_v5, %v39_v6 }
  0x81   :  { %46 = vst.msk [vmem:[%s117_s3] sm:$0xff] %vm45_vm1, %v44_v7 }
  0x82   :  { %51 = vsyncpa [#allocation4], 1 }

</bundles_post_ra>
